<compile_context>
chip_gen: v7x
topology: tpu7x:2x2x1
jax: 0.10.0
libtpu: 0.0.40
codegen_flags: <defaults>
</compile_context>

<pallas_src>
import jax
import jax.numpy as jnp
from jax.experimental import pallas as pl
from jax.experimental.pallas import tpu as pltpu

HID_SIZE = 64


def _cdiv(a, b):
    return -(-a // b)


def _round_up(a, b):
    return _cdiv(a, b) * b


def _critic_kernel(x_ref, w1_ref, b1_ref, w2_ref, b2_ref, w3_ref, b3_ref, out_ref):
    """Fused 3-layer value MLP for one batch tile.

    Per-grid-step shapes:
      x_ref  : (TB, obs)   f32/bf16 -- batch rows on sublanes, features on lanes
      w1_ref : (HID, obs)  bf16
      b1_ref : (HID, 1)    f32
      w2_ref : (HID, HID)  bf16
      b2_ref : (HID, 1)    f32
      w3_ref : (HID, 1)    f32
      b3_ref : (1, 1)      f32
      out_ref: (1, TB)     f32   -- lane-dense row of per-example values
    """
    x = x_ref[...].astype(jnp.bfloat16)                         # no-op if x is bf16

    # Layer 1: h1t[f, b] = sum_k W1[f, k] * x[b, k]  -> (HID, TB) on the MXU.
    h1t = jax.lax.dot_general(
        w1_ref[...], x, (((1,), (1,)), ((), ())),
        preferred_element_type=jnp.float32)
    h1t = jnp.maximum(h1t + b1_ref[...], 0.0)                   # VPU, f32

    # Layer 2: W2 @ h1t -> (HID, TB) on the MXU.
    h2t = jax.lax.dot_general(
        w2_ref[...], h1t.astype(jnp.bfloat16), (((1,), (0,)), ((), ())),
        preferred_element_type=jnp.float32)
    h2t = jnp.maximum(h2t + b2_ref[...], 0.0)                   # VPU, f32

    # Layer 3 (64 -> 1): off the MXU.  VPU multiply + sublane reduce (XLU)
    # produces the (1, TB) lane-dense row directly -> unmasked store.
    v = jnp.sum(h2t * w3_ref[...], axis=0, keepdims=True) + b3_ref[...]
    out_ref[...] = v.astype(out_ref.dtype)


def _vmem_usage_budget_bytes():
    """Generation-aware budget for kernel-owned VMEM usage."""
    try:
        kind = jax.devices()[0].device_kind.lower()
    except Exception:  # pragma: no cover - defensive
        kind = ""
    if "v5 lite" in kind or "v5e" in kind or "v5lite" in kind:
        return 12 << 20          # conservative on v5e
    return 24 << 20              # v4/v6e/v7x: plenty of headroom under 32 MiB limit


def _vmem_limit_bytes():
    # Budget + headroom for Mosaic-internal temporaries; <= physical VMEM on
    # every generation (v5e/v6e: 128 MiB, v7x: 64 MiB per TC).
    return min(_vmem_usage_budget_bytes() + (8 << 20), 32 << 20)


def _choose_block_b(batch, obs_size, x_itemsize):
    """Batch tile: as large as the VMEM budget allows (honest accounting),
    128-aligned, capped at 8192, and kept small enough that big batches still
    produce >= 2 grid steps (megacore on v7x)."""
    budget = _vmem_usage_budget_bytes()
    obs_pad = _round_up(obs_size, 128)                 # lane padding in VMEM

    # Bytes of VMEM that scale with each batch row of the tile.
    per_row = (2 * obs_pad * x_itemsize                # double-buffered x tile
               + obs_pad * 2                           # in-kernel bf16 copy of x
               + 2 * HID_SIZE * 4                      # h1t + h2t f32 columns
               + 2 * 8 * 4)                            # double-buffered (1, TB) output
    # Batch-independent VMEM (weights double-buffered even though constant).
    fixed = (2 * (HID_SIZE * obs_pad * 2 + HID_SIZE * 128 * 2)   # W1, W2 (bf16)
             + 4 * 8 * 128 * 4                                   # b1, b2, w3, b3 (padded)
             + (1 << 20))                                        # slack for Mosaic temps

    # NOTE: assumes obs_size is PPO-scale (<= a few thousand) so that W1 and a
    # 128-row x tile fit VMEM; the 128 floor is the lane-dense output minimum.
    max_tb = max(128, ((budget - fixed) // per_row) // 128 * 128)
    max_tb = min(max_tb, 8192)

    if batch <= max_tb:
        if batch <= 256:
            return batch                               # single full-array block
        # Enough rows for 2+ tiles: keep the grid >= 2 so both v7x TCs get work.
        return min(max_tb, _round_up(_cdiv(batch, 2), 128))
    return max_tb


def model_critic_forward(x, params, *, block_b=None):
    """x: [B, obs_size] (f32 or bf16) -> [B, 1] float32."""
    w1, b1, w2, b2, w3, b3 = params
    batch, obs_size = x.shape
    x_itemsize = x.dtype.itemsize

    tb = _choose_block_b(batch, obs_size, x_itemsize) if block_b is None else block_b
    num_tiles = _cdiv(batch, tb)                       # ragged last block, no jnp.pad

    weight_bytes = sum(int(a.size) * a.dtype.itemsize
                       for a in (w1, b1, w2, b2, w3, b3))
    cost = pl.CostEstimate(
        flops=2 * batch * (HID_SIZE * obs_size + HID_SIZE * HID_SIZE + HID_SIZE),
        transcendentals=0,
        bytes_accessed=batch * obs_size * x_itemsize + batch * 4 + weight_bytes)

    const = lambda a: pl.BlockSpec(a.shape, lambda i: (0, 0))   # VMEM-resident params

    out_row = pl.pallas_call(
        _critic_kernel,
        out_shape=jax.ShapeDtypeStruct((1, batch), jnp.float32),
        grid=(num_tiles,),
        in_specs=[
            pl.BlockSpec((tb, obs_size), lambda i: (i, 0)),     # streamed x tiles
            const(w1), const(b1),
            const(w2), const(b2),
            const(w3), const(b3),
        ],
        out_specs=pl.BlockSpec((1, tb), lambda i: (0, i)),      # lane-dense output row
        compiler_params=pltpu.CompilerParams(
            # Batch tiles are independent.  On v7x, if profiling shows only one
            # TensorCore busy, switch to pltpu.CORE_PARALLEL for this axis.
            dimension_semantics=("parallel",),
            vmem_limit_bytes=_vmem_limit_bytes(),
        ),
        cost_estimate=cost,
    )(x, w1, b1, w2, b2, w3, b3)

    return out_row.reshape(batch, 1)


def init_params(key, obs_size):
    """PyTorch nn.Linear-style init (U(-1/sqrt(fan_in), 1/sqrt(fan_in))).

    Weights in PyTorch's [out, in] layout.  W1/W2 are stored bf16 (MXU
    operands, VMEM-resident); biases, W3, b3 stay f32.  W3 is stored as a
    (HID, 1) column for the in-kernel sublane reduce.
    """
    def linear(key, fan_in, fan_out):
        kw, kb = jax.random.split(key)
        bound = 1.0 / (fan_in ** 0.5)
        w = jax.random.uniform(kw, (fan_out, fan_in), jnp.float32, -bound, bound)
        b = jax.random.uniform(kb, (fan_out, 1), jnp.float32, -bound, bound)
        return w, b

    k1, k2, k3 = jax.random.split(key, 3)
    w1, b1 = linear(k1, obs_size, HID_SIZE)
    w2, b2 = linear(k2, HID_SIZE, HID_SIZE)
    w3, b3 = linear(k3, HID_SIZE, 1)                 # w3: (1, HID), b3: (1, 1)
    return (w1.astype(jnp.bfloat16), b1,
            w2.astype(jnp.bfloat16), b2,
            w3.T, b3)                                # w3 stored as (HID, 1)


def reference_forward_matched(x, params):
    """Pure-JAX reference applying the same bf16 operand rounding as the kernel."""
    w1, b1, w2, b2, w3, b3 = params
    xb = x.astype(jnp.bfloat16)
    h1 = jnp.maximum(
        jax.lax.dot_general(w1, xb, (((1,), (1,)), ((), ())),
                            preferred_element_type=jnp.float32) + b1, 0.0)
    h2 = jnp.maximum(
        jax.lax.dot_general(w2, h1.astype(jnp.bfloat16), (((1,), (0,)), ((), ())),
                            preferred_element_type=jnp.float32) + b2, 0.0)
    v = jnp.sum(h2 * w3, axis=0, keepdims=True) + b3          # (1, B)
    return v.T                                                # (B, 1)


def reference_forward_f32(x, params):
    """f32 reference matching the PyTorch module's math (x @ W^T + b).

    Note: the kernel quantizes x, W1, W2 and h1 to bf16 for the MXU, so it
    deviates slightly from pure f32 PyTorch semantics (checked with a looser
    tolerance below).
    """
    w1, b1, w2, b2, w3, b3 = params
    w1f, w2f = w1.astype(jnp.float32), w2.astype(jnp.float32)
    xf = x.astype(jnp.float32)
    h1 = jnp.maximum(xf @ w1f.T + b1.T, 0.0)
    h2 = jnp.maximum(h1 @ w2f.T + b2.T, 0.0)
    return h2 @ w3 + b3                                       # (B, 1)


if __name__ == "__main__":
    key = jax.random.PRNGKey(0)
    kx, kp = jax.random.split(key)

    batch = 8
    obs_size = 32

    params = init_params(kp, obs_size)
    x = jax.random.normal(kx, (batch, obs_size), dtype=jnp.float32)

    out = jax.block_until_ready(model_critic_forward(x, params))
    assert out.shape == (batch, 1), out.shape

    # Tight check vs. a reference with identical bf16 operand rounding.
    ref_m = reference_forward_matched(x, params)
    assert jnp.allclose(out, ref_m, atol=1e-3, rtol=1e-3), (out, ref_m)
    # Looser check vs. the pure-f32 PyTorch-semantics reference.
    ref_f = reference_forward_f32(x, params)
    assert jnp.allclose(out, ref_f, atol=3e-2, rtol=3e-2), (out, ref_f)

    # bf16 activation streaming (half the HBM bytes on the only O(B*obs) stream).
    x_bf = x.astype(jnp.bfloat16)
    out_bf = jax.block_until_ready(model_critic_forward(x_bf, params))
    ref_bf = reference_forward_matched(x_bf, params)
    assert jnp.allclose(out_bf, ref_bf, atol=1e-3, rtol=1e-3), (out_bf, ref_bf)

    # Ragged multi-tile path: grid = 3, partial last block, no jnp.pad round-trip.
    x2 = jax.random.normal(kx, (260, obs_size), dtype=jnp.float32)
    out2 = jax.block_until_ready(model_critic_forward(x2, params, block_b=128))
    assert out2.shape == (260, 1), out2.shape
    ref2 = reference_forward_matched(x2, params)
    assert jnp.allclose(out2, ref2, atol=1e-3, rtol=1e-3), (out2, ref2)

    # Auto-tiled larger batch: exercises _choose_block_b and the grid>=2 path.
    x3 = jax.random.normal(kx, (300, obs_size), dtype=jnp.float32)
    out3 = jax.block_until_ready(model_critic_forward(x3, params))
    assert out3.shape == (300, 1), out3.shape
    ref3 = reference_forward_matched(x3, params)
    assert jnp.allclose(out3, ref3, atol=1e-3, rtol=1e-3), (out3, ref3)

    print("KERNEL_OK")
</pallas_src>

<mosaic_0001>
module attributes {stable_mosaic.version = 11 : i64} {
  func.func @_critic_kernel(%arg0: i32, %arg1: memref<8x32xf32, #tpu.memory_space<vmem>>, %arg2: memref<64x32xbf16, #tpu.memory_space<vmem>>, %arg3: memref<64x1xf32, #tpu.memory_space<vmem>>, %arg4: memref<64x64xbf16, #tpu.memory_space<vmem>>, %arg5: memref<64x1xf32, #tpu.memory_space<vmem>>, %arg6: memref<64x1xf32, #tpu.memory_space<vmem>>, %arg7: memref<1x1xf32, #tpu.memory_space<vmem>>, %arg8: memref<1x8xf32, #tpu.memory_space<vmem>>) attributes {dimension_semantics = [#tpu.dimension_semantics<parallel>], iteration_bounds = array<i64: 1>, scalar_prefetch = 0 : i64, scratch_operands = 0 : i64, tpu.core_type = #tpu.core_type<tc>, window_params = [{transform_indices = @transform_0, window_bounds = array<i64: 8, 32>}, {pipeline_mode = #tpu.pipeline_mode<synchronous>, transform_indices = @transform_1, window_bounds = array<i64: 64, 32>}, {pipeline_mode = #tpu.pipeline_mode<synchronous>, transform_indices = @transform_2, window_bounds = array<i64: 64, 1>}, {pipeline_mode = #tpu.pipeline_mode<synchronous>, transform_indices = @transform_3, window_bounds = array<i64: 64, 64>}, {pipeline_mode = #tpu.pipeline_mode<synchronous>, transform_indices = @transform_4, window_bounds = array<i64: 64, 1>}, {pipeline_mode = #tpu.pipeline_mode<synchronous>, transform_indices = @transform_5, window_bounds = array<i64: 64, 1>}, {pipeline_mode = #tpu.pipeline_mode<synchronous>, transform_indices = @transform_6, window_bounds = array<i64: 1, 1>}, {transform_indices = @transform_7, window_bounds = array<i64: 1, 8>}]} {
    %c0 = arith.constant 0 : index
    %c0_0 = arith.constant 0 : index
    %0 = vector.load %arg1[%c0, %c0_0] : memref<8x32xf32, #tpu.memory_space<vmem>>, vector<8x32xf32>
    %1 = arith.truncf %0 : vector<8x32xf32> to vector<8x32xbf16>
    %c0_1 = arith.constant 0 : index
    %c0_2 = arith.constant 0 : index
    %2 = vector.load %arg2[%c0_1, %c0_2] : memref<64x32xbf16, #tpu.memory_space<vmem>>, vector<64x32xbf16>
    %cst = arith.constant dense<0.000000e+00> : vector<64x8xf32>
    %3 = tpu.matmul %2, %1, %cst {dimension_numbers = #tpu.dot_dimension_numbers<[1], [1], [0], [0], [0, 0, 1, 0], [], []>} : vector<64x32xbf16>, vector<8x32xbf16>, vector<64x8xf32> -> vector<64x8xf32>
    %c0_3 = arith.constant 0 : index
    %c0_4 = arith.constant 0 : index
    %4 = vector.load %arg3[%c0_3, %c0_4] : memref<64x1xf32, #tpu.memory_space<vmem>>, vector<64x1xf32>
    %5 = vector.broadcast %4 : vector<64x1xf32> to vector<64x8xf32>
    %6 = arith.addf %3, %5 : vector<64x8xf32>
    %cst_5 = arith.constant 0.000000e+00 : f32
    %7 = vector.broadcast %cst_5 : f32 to vector<64x8xf32>
    %8 = arith.maximumf %6, %7 : vector<64x8xf32>
    %c0_6 = arith.constant 0 : index
    %c0_7 = arith.constant 0 : index
    %9 = vector.load %arg4[%c0_6, %c0_7] : memref<64x64xbf16, #tpu.memory_space<vmem>>, vector<64x64xbf16>
    %10 = arith.truncf %8 : vector<64x8xf32> to vector<64x8xbf16>
    %cst_8 = arith.constant dense<0.000000e+00> : vector<64x8xf32>
    %11 = tpu.matmul %9, %10, %cst_8 {dimension_numbers = #tpu.dot_dimension_numbers<[1], [0], [0], [1], [0, 0, 1, 1], [], []>} : vector<64x64xbf16>, vector<64x8xbf16>, vector<64x8xf32> -> vector<64x8xf32>
    %c0_9 = arith.constant 0 : index
    %c0_10 = arith.constant 0 : index
    %12 = vector.load %arg5[%c0_9, %c0_10] : memref<64x1xf32, #tpu.memory_space<vmem>>, vector<64x1xf32>
    %13 = vector.broadcast %12 : vector<64x1xf32> to vector<64x8xf32>
    %14 = arith.addf %11, %13 : vector<64x8xf32>
    %cst_11 = arith.constant 0.000000e+00 : f32
    %15 = vector.broadcast %cst_11 : f32 to vector<64x8xf32>
    %16 = arith.maximumf %14, %15 : vector<64x8xf32>
    %c0_12 = arith.constant 0 : index
    %c0_13 = arith.constant 0 : index
    %17 = vector.load %arg6[%c0_12, %c0_13] : memref<64x1xf32, #tpu.memory_space<vmem>>, vector<64x1xf32>
    %18 = vector.broadcast %17 : vector<64x1xf32> to vector<64x8xf32>
    %19 = arith.mulf %16, %18 : vector<64x8xf32>
    %cst_14 = arith.constant dense<0.000000e+00> : vector<8xf32>
    %20 = vector.multi_reduction <add>, %19, %cst_14 [0] : vector<64x8xf32> to vector<8xf32>
    %21 = vector.shape_cast %20 : vector<8xf32> to vector<1x8xf32>
    %c0_15 = arith.constant 0 : index
    %c0_16 = arith.constant 0 : index
    %22 = vector.load %arg7[%c0_15, %c0_16] : memref<1x1xf32, #tpu.memory_space<vmem>>, vector<1x1xf32>
    %23 = vector.broadcast %22 : vector<1x1xf32> to vector<1x8xf32>
    %24 = arith.addf %21, %23 : vector<1x8xf32>
    %c0_17 = arith.constant 0 : index
    %c0_18 = arith.constant 0 : index
    %25 = vector.load %arg8[%c0_17, %c0_18] : memref<1x8xf32, #tpu.memory_space<vmem>>, vector<1x8xf32>
    tpu.vector_store %arg8[%c0_17, %c0_18], %24 {strides = array<i32>} : memref<1x8xf32, #tpu.memory_space<vmem>>, vector<1x8xf32>,
    return
  }
  func.func @transform_0(%arg0: i32) -> (i32, i32) {
    %c0_i32 = arith.constant 0 : i32
    %c0_i32_0 = arith.constant 0 : i32
    return %arg0, %c0_i32 : i32, i32
  }
  func.func @transform_1(%arg0: i32) -> (i32, i32) {
    %c0_i32 = arith.constant 0 : i32
    %c0_i32_0 = arith.constant 0 : i32
    %c0_i32_1 = arith.constant 0 : i32
    return %c0_i32, %c0_i32_0 : i32, i32
  }
  func.func @transform_2(%arg0: i32) -> (i32, i32) {
    %c0_i32 = arith.constant 0 : i32
    %c0_i32_0 = arith.constant 0 : i32
    %c0_i32_1 = arith.constant 0 : i32
    return %c0_i32, %c0_i32_0 : i32, i32
  }
  func.func @transform_3(%arg0: i32) -> (i32, i32) {
    %c0_i32 = arith.constant 0 : i32
    %c0_i32_0 = arith.constant 0 : i32
    %c0_i32_1 = arith.constant 0 : i32
    return %c0_i32, %c0_i32_0 : i32, i32
  }
  func.func @transform_4(%arg0: i32) -> (i32, i32) {
    %c0_i32 = arith.constant 0 : i32
    %c0_i32_0 = arith.constant 0 : i32
    %c0_i32_1 = arith.constant 0 : i32
    return %c0_i32, %c0_i32_0 : i32, i32
  }
  func.func @transform_5(%arg0: i32) -> (i32, i32) {
    %c0_i32 = arith.constant 0 : i32
    %c0_i32_0 = arith.constant 0 : i32
    %c0_i32_1 = arith.constant 0 : i32
    return %c0_i32, %c0_i32_0 : i32, i32
  }
  func.func @transform_6(%arg0: i32) -> (i32, i32) {
    %c0_i32 = arith.constant 0 : i32
    %c0_i32_0 = arith.constant 0 : i32
    %c0_i32_1 = arith.constant 0 : i32
    return %c0_i32, %c0_i32_0 : i32, i32
  }
  func.func @transform_7(%arg0: i32) -> (i32, i32) {
    %c0_i32 = arith.constant 0 : i32
    %c0_i32_0 = arith.constant 0 : i32
    return %c0_i32, %arg0 : i32, i32
  }
}

</mosaic_0001>

<bundles_post_ra>
// kernel: tpu_custom_call.1
= control target key start
LH: loop header
LB: loop body
LE: loop exit
PB: predicated region body
PF: predicated region fallthrough
CT: control target
= control target key end

     0   :  { %s734_s0 = inlined_call_operand.vmem [shape: f32[8,32], index: 0, kind: input, shape index: {}]   ;;  %s735_s1 = inlined_call_operand.vmem [shape: bf16[64,32], index: 1, kind: input, shape index: {}]   ;;  %s736_s2 = inlined_call_operand.vmem [shape: f32[64,1], index: 2, kind: input, shape index: {}]   ;;  %s737_s3 = inlined_call_operand.vmem [shape: bf16[64,64], index: 3, kind: input, shape index: {}]   ;;  %s738_s4 = inlined_call_operand.vmem [shape: f32[64,1], index: 4, kind: input, shape index: {}]   ;;  %s739_s5 = inlined_call_operand.vmem [shape: f32[64,1], index: 5, kind: input, shape index: {}]   ;;  %s740_s6 = inlined_call_operand.<no memory space> [shape: f32[1,1], index: 6, kind: input, shape index: {}]   ;;  %s741_s7 = inlined_call_operand.hbm [shape: f32[1,8], index: 7, kind: output, shape index: {}]  }
   0x1   :  { %v12_v0 = vstv %s740_s6 }
   0x2   :  { %13 = vst [vmem:[#allocation2] sm:$0x1] %v12_v0 }
   0x3   :  { %v30_v1 = vld [vmem:[%s734_s0] sm:$0xff]  ;;  %vm108_vm0 = vcmask 261120   ;;  %v560_v4 = vmov 0   ;;  %v42_v7 = vld [vmem:[%s736_s2 + $0x10] sm:$0xff]  ;;  %v41_v8 = vld [vmem:[%s736_s2 + $0x8] sm:$0xff] }
   0x4   :  { %v31_v2 = vpack.c.bf16 %v30_v1, %v30_v1  ;;  %v528_v3 = vld [vmem:[%s735_s1] sm:$0xff]   ;;  %526 = vset.pattern.permute.xlu0 %v560_v4  ;;  %527 = vset.pattern.permute.xlu1 %v560_v4  ;;  %v529_v9 = vld [vmem:[%s735_s1 + $0x8] sm:$0xff]   ;;  %v43_v10 = vld [vmem:[%s736_s2 + $0x18] sm:$0xff] }
   0x5   :  { %499 = vmatprep.mubr.msk.bf16.mxu0 %vm108_vm0, %v528_v3  ;;  %v40_v6 = vld [vmem:[%s736_s2] sm:$0xff]  ;;  %60 = vperm.xlu1 %527, %v42_v7   ;;  %v530_v11 = vld [vmem:[%s735_s1 + $0x10] sm:$0xff]   ;;  %v45_v13 = vld [vmem:[%s736_s2 + $0x28] sm:$0xff] }
   0x6   :  { %523 = vmatprep.subr.msk.bf16.mxu0 %vm108_vm0, %v31_v2  ;;  %v122_v5 = vsel %vm108_vm0, %v31_v2, 0  ;;  %50 = vperm.xlu0 %526, %v40_v6   ;;  %v44_v12 = vld [vmem:[%s736_s2 + $0x20] sm:$0xff]  ;;  %v46_v14 = vld [vmem:[%s736_s2 + $0x30] sm:$0xff]  ;;  %v531_v15 = vld [vmem:[%s735_s1 + $0x18] sm:$0xff]  }
   0x7   :  { %498 = vmatpush3.bf16.xpose.msra.mxu0 %v122_v5  ;;  %v47_v16 = vld [vmem:[%s736_s2 + $0x38] sm:$0xff] }
   0x9   :  { %65 = vperm.xlu1 %527, %v43_v10  }
   0xa   :  { %55 = vperm.xlu0 %526, %v41_v8  }
   0xd   :  { %75 = vperm.xlu1 %527, %v45_v13  }
   0xe   :  { %500 = vmatmul.mubr.msk.bf16.vlgmr.msra.gmra.mrb[0].mxu0 %vm108_vm0, %v529_v9  ;;  %70 = vperm.xlu0 %526, %v44_v12  }
   0xf   :  { %503 = vmatprep.mubr.msk.bf16.mxu0 %vm108_vm0, %v530_v11 }
  0x10   :  { %14 = vsyncpa [#allocation4], 0  ;;  %v209_v17 = vld [vmem:[%s738_s4] sm:$0xff]  ;;  %v210_v18 = vld [vmem:[%s738_s4 + $0x8] sm:$0xff]  ;;  %vm277_vm1 = vcmask 523264   ;;  %vm419_vm2 = vcmask 64512  }
  0x11   :  { %85 = vperm.xlu1 %527, %v47_v16   ;;  %v211_v19 = vld [vmem:[%s738_s4 + $0x10] sm:$0xff]  ;;  %v212_v20 = vld [vmem:[%s738_s4 + $0x18] sm:$0xff]  ;;  %v363_v21 = vld [vmem:[%s739_s5] sm:$0xff]  ;;  %vm452_vm3 = vcmask 57344  }
  0x12   :  { %80 = vperm.xlu0 %526, %v46_v14   ;;  %v364_v22 = vld [vmem:[%s739_s5 + $0x8] sm:$0xff]  ;;  %v213_v23 = vld [vmem:[%s738_s4 + $0x20] sm:$0xff]  ;;  %v365_v24 = vld [vmem:[%s739_s5 + $0x10] sm:$0xff] }
  0x13   :  { %v214_v25 = vld [vmem:[%s738_s4 + $0x28] sm:$0xff]  ;;  %v366_v26 = vld [vmem:[%s739_s5 + $0x18] sm:$0xff]  ;;  %v215_v27 = vld [vmem:[%s738_s4 + $0x30] sm:$0xff] }
  0x14   :  { %v367_v28 = vld [vmem:[%s739_s5 + $0x20] sm:$0xff]  ;;  %v216_v29 = vld [vmem:[%s738_s4 + $0x38] sm:$0xff]  ;;  %v368_v30 = vld [vmem:[%s739_s5 + $0x28] sm:$0xff] }
  0x15   :  { %224 = vperm.xlu1 %527, %v210_v18   ;;  %v369_v31 = vld [vmem:[%s739_s5 + $0x30] sm:$0xff]  ;;  %v370_v32 = vld [vmem:[%s739_s5 + $0x38] sm:$0xff]  ;;  %v441_v33 = vld [vmem:[#allocation2] sm:$0x1] }
  0x16   :  { %504 = vmatmul.mubr.msk.bf16.gmra.mrb[4].mxu0 %vm108_vm0, %v531_v15  ;;  %219 = vperm.xlu0 %526, %v209_v17   ;;  %v532_v34 = vld [vmem:[%s737_s3] sm:$0xff]   ;;  %v533_v7 = vld [vmem:[%s737_s3 + $0x8] sm:$0xff]   ;;  %v534_v8 = vld [vmem:[%s737_s3 + $0x10] sm:$0xff]  }
  0x17   :  { %515 = vmatprep.mubr.msk.bf16.mxu1 %vm277_vm1, %v532_v34  ;;  %v535_v9 = vld [vmem:[%s737_s3 + $0x18] sm:$0xff]   ;;  %s561_s3 = smov [#allocation3]  }
  0x18   :  { %s460_s11 = sshll.u32 %s561_s3, 4  ;;  %s461_s11 = int_to_ptr.vmem [resolvable:$true] %s460_s11 }
  0x19   :  { %234 = vperm.xlu1 %527, %v212_v20   ;;  %s536_s12 = scalar_lea.vmem %s461_s11, 16  ;;  %s540_s13 = scalar_lea.vmem %s461_s11, 32 }
  0x1a   :  { %229 = vperm.xlu0 %526, %v211_v19   ;;  %p537_p0 = scmp.ne.s32.totalorder %s461_s11, %s536_s12  ;;  %p541_p1 = scmp.lt.s32.totalorder %s461_s11, %s461_s11 }
  0x1b   :  { %p542_p2 = scmp.lt.s32.totalorder %s540_s13, %s536_s12 }
  0x1d   :  { %378 = vperm.xlu1 %527, %v364_v22   ;;  %p543_p3 = por %p542_p2, %p541_p1 }
  0x1e   :  { %373 = vperm.xlu0 %526, %v363_v21  }
  0x1f   :  { %p544_p4 = pnand %p543_p3, %p537_p0 }
  0x21   :  { %383 = vperm.xlu1 %527, %v365_v24  }
  0x22   :  { %239 = vperm.xlu0 %526, %v213_v23  }
  0x25   :  { %388 = vperm.xlu1 %527, %v366_v26  }
  0x26   :  { %244 = vperm.xlu0 %526, %v214_v25  }
  0x29   :  { %393 = vperm.xlu1 %527, %v367_v28  }
  0x2a   :  { %249 = vperm.xlu0 %526, %v215_v27  }
  0x2d   :  { %398 = vperm.xlu1 %527, %v368_v30  }
  0x2e   :  { %254 = vperm.xlu0 %526, %v216_v29  }
  0x31   :  { %408 = vperm.xlu1 %527, %v370_v32  }
  0x32   :  { %403 = vperm.xlu0 %526, %v369_v31  }
  0x36   :  { %444 = vperm.xlu0 %526, %v441_v33  }
  0x84   :  { %v61_v36 = vpop.permute.xlu1 %60 }
  0x85   :  { %v51_v35 = vpop.permute.xlu0 %50 }
  0x88   :  { %v66_v38 = vpop.permute.xlu1 %65 }
  0x89   :  { %v56_v37 = vpop.permute.xlu0 %55 }
  0x8c   :  { %v76_v47 = vpop.permute.xlu1 %75 }
  0x8d   :  { %v71_v42 = vpop.permute.xlu0 %70 }
  0x90   :  { %v86_v59 = vpop.permute.xlu1 %85 }
  0x91   :  { %v81_v54 = vpop.permute.xlu0 %80 }
  0x94   :  { %v225_v11 = vpop.permute.xlu1 %224 }
  0x95   :  { %v220_v10 = vpop.permute.xlu0 %219 }
  0x98   :  { %v235_v13 = vpop.permute.xlu1 %234 }
  0x99   :  { %v230_v12 = vpop.permute.xlu0 %229 }
  0x9c   :  { %v379_v15 = vpop.permute.xlu1 %378 }
  0x9d   :  { %v374_v14 = vpop.permute.xlu0 %373 }
  0xa0   :  { %v384_v17 = vpop.permute.xlu1 %383 }
  0xa1   :  { %v240_v16 = vpop.permute.xlu0 %239 }
  0xa4   :  { %v389_v19 = vpop.permute.xlu1 %388 }
  0xa5   :  { %v245_v18 = vpop.permute.xlu0 %244 }
  0xa8   :  { %v394_v31 = vpop.permute.xlu1 %393 }
  0xa9   :  { %v250_v25 = vpop.permute.xlu0 %249 }
  0xe1   :  { %v501_v39 = vpop.f32.mrb[0].mxu0 }
  0xe2   :  { %v167_v40 = vadd.f32 %v501_v39, %v61_v36  ;;  %v158_v41 = vpop.f32.mrb[1].mxu0 }
  0xe3   :  { %v159_v43 = vadd.f32 %v158_v41, %v51_v35  ;;  %v502_v44 = vpop.f32.mrb[2].mxu0 }
  0xe4   :  { %v170_v45 = vadd.f32 %v502_v44, %v66_v38  ;;  %v161_v46 = vpop.f32.mrb[3].mxu0  ;;  %v191_v49 = vmax.f32 %v167_v40, 0.0  ;;  %v255_v38 = vpop.permute.xlu0 %254 }
  0xe5   :  { %v162_v48 = vadd.f32 %v161_v46, %v56_v37  ;;  %v189_v51 = vmax.f32 %v159_v43, 0.0  ;;  %v399_v46 = vpop.permute.xlu1 %398 }
  0xe6   :  { %v192_v50 = vmax.f32 %v170_v45, 0.0 }
  0xe7   :  { %v190_v52 = vmax.f32 %v162_v48, 0.0 }
  0xe8   :  { %v206_v53 = vpack.c.bf16 %v192_v50, %v191_v49 }
  0xe9   :  { %v505_v55 = vpop.f32.mrb[4].mxu0  ;;  %v205_v56 = vpack.c.bf16 %v190_v52, %v189_v51 }
  0xea   :  { %v183_v57 = vadd.f32 %v505_v55, %v81_v54  ;;  %v174_v58 = vpop.f32.mrb[5].mxu0 }
  0xeb   :  { %v175_v60 = vadd.f32 %v174_v58, %v71_v42  ;;  %v506_v61 = vpop.f32.mrb[6].mxu0  ;;  %507 = vmatprep.subr.bf16.mxu1 %v205_v56 }
  0xec   :  { %v186_v62 = vadd.f32 %v506_v61, %v86_v59  ;;  %v177_v63 = vpop.f32.mrb[7].mxu0  ;;  %508 = vmatpush3.bf16.msra.mxu1 %v205_v56  ;;  %v195_v1 = vmax.f32 %v183_v57, 0.0  ;;  %v404_v59 = vpop.permute.xlu0 %403 }
  0xed   :  { %v178_v0 = vadd.f32 %v177_v63, %v76_v47  ;;  %509 = vmatprep.subr.bf16.mxu1 %v206_v53  ;;  %v193_v3 = vmax.f32 %v175_v60, 0.0 }
  0xee   :  { %v196_v2 = vmax.f32 %v186_v62, 0.0 }
  0xef   :  { %v194_v4 = vmax.f32 %v178_v0, 0.0  ;;  %v409_v0 = vpop.permute.xlu1 %408 }
  0xf0   :  { %v208_v5 = vpack.c.bf16 %v196_v2, %v195_v1  ;;  %510 = vmatpush3.bf16.msra.mxu1 %v206_v53 }
  0xf1   :  { %v207_v6 = vpack.c.bf16 %v194_v4, %v193_v3 }
  0xf3   :  { %511 = vmatprep.subr.bf16.mxu1 %v207_v6 }
  0xf4   :  { %512 = vmatpush3.bf16.msra.mxu1 %v207_v6 }
  0xf5   :  { %513 = vmatprep.subr.bf16.mxu1 %v208_v5 }
  0xf8   :  { %514 = vmatpush3.bf16.msra.mxu1 %v208_v5 }
  0xfb   :  { %516 = vmatmul.mubr.msk.bf16.vlgmr.msra.gmra.mrb[0].mxu1 %vm277_vm1, %v533_v7 }
  0xfc   :  { %519 = vmatprep.mubr.msk.bf16.mxu1 %vm277_vm1, %v534_v8  ;;  %v447_v8 = vlaneseq }
 0x103   :  { %520 = vmatmul.mubr.msk.bf16.gmra.mrb[4].mxu1 %vm277_vm1, %v535_v9 }
 0x1ce   :  { %v517_v20 = vpop.f32.mrb[0].mxu1 }
 0x1cf   :  { %v333_v21 = vadd.f32 %v517_v20, %v230_v12  ;;  %v324_v22 = vpop.f32.mrb[1].mxu1 }
 0x1d0   :  { %v325_v23 = vadd.f32 %v324_v22, %v220_v10  ;;  %v518_v24 = vpop.f32.mrb[2].mxu1 }
 0x1d1   :  { %v336_v26 = vadd.f32 %v518_v24, %v235_v13  ;;  %v327_v27 = vpop.f32.mrb[3].mxu1  ;;  %v357_v28 = vmax.f32 %v333_v21, 0.0 }
 0x1d2   :  { %v355_v29 = vmax.f32 %v325_v23, 0.0  ;;  %v328_v30 = vadd.f32 %v327_v27, %v225_v11  ;;  %v448_v11 = vshrl.u32 %v447_v8, 7 }
 0x1d3   :  { %v358_v33 = vmax.f32 %v336_v26, 0.0  ;;  %v413_v35 = vmul.f32 %v384_v17, %v357_v28 }
 0x1d4   :  { %v411_v32 = vmul.f32 %v374_v14, %v355_v29  ;;  %v356_v34 = vmax.f32 %v328_v30, 0.0  ;;  %v449_v14 = vsub.s32 0, %v448_v11 }
 0x1d5   :  { %v414_v42 = vmul.f32 %v389_v19, %v358_v33  ;;  %v423_v50 = vsel %vm419_vm2, %v413_v35, 0.0 }
 0x1d6   :  { %v412_v36 = vmul.f32 %v379_v15, %v356_v34  ;;  %v521_v37 = vpop.f32.mrb[4].mxu1  ;;  %v420_v41 = vsel %vm419_vm2, %v411_v32, 0.0 }
 0x1d7   :  { %v349_v39 = vadd.f32 %v521_v37, %v250_v25  ;;  %v340_v40 = vpop.f32.mrb[5].mxu1  ;;  %v425_v55 = vsel %vm419_vm2, %v414_v42, 0.0 }
 0x1d8   :  { %v421_v43 = vsel %vm419_vm2, %v412_v36, 0.0  ;;  %v341_v44 = vadd.f32 %v340_v40, %v240_v16  ;;  %v522_v45 = vpop.f32.mrb[6].mxu1  ;;  %v445_v16 = vpop.permute.xlu0 %444 }
 0x1d9   :  { %v422_v47 = vadd.f32 %v421_v43, %v420_v41  ;;  %v352_v48 = vadd.f32 %v522_v45, %v255_v38  ;;  %v343_v49 = vpop.f32.mrb[7].mxu1  ;;  %v361_v51 = vmax.f32 %v349_v39, 0.0 }
 0x1da   :  { %v359_v52 = vmax.f32 %v341_v44, 0.0  ;;  %v344_v53 = vadd.f32 %v343_v49, %v245_v18  ;;  %v450_v18 = vrot.slane %v445_v16, %v449_v14 }
 0x1db   :  { %v424_v54 = vadd.f32 %v423_v50, %v422_v47  ;;  %v362_v57 = vmax.f32 %v352_v48, 0.0  ;;  %v417_v61 = vmul.f32 %v404_v59, %v361_v51 }
 0x1dc   :  { %v415_v56 = vmul.f32 %v394_v31, %v359_v52  ;;  %v360_v58 = vmax.f32 %v344_v53, 0.0 }
 0x1dd   :  { %v426_v60 = vadd.f32 %v425_v55, %v424_v54  ;;  %v418_v2 = vmul.f32 %v409_v0, %v362_v57  ;;  %v431_v5 = vsel %vm419_vm2, %v417_v61, 0.0 }
 0x1de   :  { %v427_v62 = vsel %vm419_vm2, %v415_v56, 0.0  ;;  %v416_v63 = vmul.f32 %v399_v46, %v360_v58 }
 0x1df   :  { %v428_v1 = vadd.f32 %v427_v62, %v426_v60  ;;  %v433_v7 = vsel %vm419_vm2, %v418_v2, 0.0 }
 0x1e0   :  { %v429_v3 = vsel %vm419_vm2, %v416_v63, 0.0 }
 0x1e1   :  { %v430_v4 = vadd.f32 %v429_v3, %v428_v1 }
 0x1e3   :  { %v432_v6 = vadd.f32 %v431_v5, %v430_v4 }
 0x1e5   :  { %v434_v9 = vadd.f32 %v433_v7, %v432_v6 }
 0x1e7   :  { %v435_v10 = vrot.slane %v434_v9, 4 }
 0x1e9   :  { %v436_v12 = vadd.f32 %v435_v10, %v434_v9 }
 0x1eb   :  { %v437_v13 = vrot.slane %v436_v12, 2 }
 0x1ed   :  { %v438_v15 = vadd.f32 %v437_v13, %v436_v12 }
 0x1ef   :  { %v439_v17 = vrot.slane %v438_v15, 1 }
 0x1f1   :  { %v440_v19 = vadd.f32 %v439_v17, %v438_v15 }
 0x1f3   :  { %v451_v20 = vadd.f32 %v450_v18, %v440_v19 }
 0x1f5   :  { %453 = vst.msk [vmem:[#allocation3] sm:$0x1] %vm452_vm3, %v451_v20 }
 0x1f6   :  { %547 = shalt.err (!%p544_p4)
}
 0x1f7   :  { %s548_s16 = scalar_lea.hbm %s741_s7, 16 }
 0x1f8   :  { %p549_p5 = scmp.ne.s32.totalorder %s741_s7, %s548_s16  ;;  %p552_p6 = scmp.lt.u32.totalorder %s548_s16, %s741_s7 }
 0x1fa   :  { %p554_p7 = pnand %p552_p6, %p549_p5 }
 0x1fc   :  { %557 = shalt.err (!%p554_p7)
}
 0x1fd   :  { %463 = dma.vmem_to_hbm [thread:$0]  %s461_s11, 16, %s741_s7, [#allocation4]  }
 0x1fe   :  { %558 = dma.done.wait [#allocation4], 16  }
 0x1ff   :  { %559 = vsyncadd [#allocation4], 4294967280 }
 0x200   :  { %467 = vsyncpa [#allocation4], 1 }

</bundles_post_ra>
